<compile_context>
chip_gen: v5e
topology: v5e:2x2
jax: 0.10.0
libtpu: 0.0.40
codegen_flags: <defaults>
</compile_context>

<pallas_src>
import jax
import jax.numpy as jnp
from jax.experimental import pallas as pl
from jax.experimental.pallas import tpu as pltpu

_VMEM_LIMIT = 32 * 1024 * 1024  # safe on v5e/v6e/v7x; demo uses far less.


# ---------------------------------------------------------------------------
# Kernel 1: hoisted input projection  gates_x = x @ W_x + bias   (gate order i|f|o|g)
# ---------------------------------------------------------------------------
def _input_proj_kernel(x_ref, w_ref, b_ref, gx_ref):
    gx_ref[...] = (jnp.dot(x_ref[...], w_ref[...],
                           preferred_element_type=jnp.float32)
                   + b_ref[...])


# ---------------------------------------------------------------------------
# Kernel 2: recurrence.  One grid step = TT LSTM steps; h/c carried in scratch.
# ---------------------------------------------------------------------------
def _recurrent_kernel(gx_ref, wh_ref, h0_ref, c0_ref,   # inputs
                      hc_ref,                           # output: [h | c] per step
                      h_scr, c_scr):                    # VMEM scratch (carries)
    H = c_scr.shape[-1]
    TT = gx_ref.shape[0]

    @pl.when(pl.program_id(0) == 0)
    def _init():
        h_scr[...] = h0_ref[...].astype(h_scr.dtype)   # bf16 carry (matmul operand)
        c_scr[...] = c0_ref[...]                       # f32 carry (exact recurrence)

    def step(t, carry):
        # Only the h-dependent dot is on the sequential path; x-gates (+bias)
        # were precomputed by the input-projection kernel.
        gates = gx_ref[t] + jnp.dot(h_scr[...], wh_ref[...],
                                    preferred_element_type=jnp.float32)
        # Gate layout [i|f|o|g]: one sigmoid pass over 3H, one tanh over H.
        sig = jax.nn.sigmoid(gates[:, :3 * H])
        i_g = sig[:, 0 * H:1 * H]
        f_g = sig[:, 1 * H:2 * H]
        o_g = sig[:, 2 * H:3 * H]
        g_g = jnp.tanh(gates[:, 3 * H:4 * H])

        c_new = f_g * c_scr[...] + i_g * g_g           # f32
        h_new = o_g * jnp.tanh(c_new)                  # f32

        h_scr[...] = h_new.astype(h_scr.dtype)         # bf16 for the next dot
        c_scr[...] = c_new
        hc_ref[t] = jnp.concatenate([h_new, c_new], axis=-1)  # one dense store
        return carry

    jax.lax.fori_loop(0, TT, step, 0, unroll=True)


# ---------------------------------------------------------------------------
# Wrapper
# ---------------------------------------------------------------------------
def _pick_row_tile(m):
    """Largest row tile (mult of 8) that divides m; full array if m % 8 != 0."""
    if m % 8 != 0:
        return m
    for cand in (512, 256, 128, 64, 32, 16, 8):
        if m % cand == 0:
            return cand
    return m


def _pick_time_chunk(t, b, h):
    """Chunk the time grid; keep the (TT,B,4H) f32 x-gates block around <=2 MiB."""
    bytes_per_step = b * 4 * h * 4
    cap = max(1, (2 * 1024 * 1024) // max(1, bytes_per_step))
    return max(1, min(8, t, cap))


def _lstm_sequence_impl(xs, h0, c0, w_x, w_h, bias):
    """Run T LSTMCell steps.

    xs:(T,B,I) f32   h0/c0:(B,H) f32
    w_x:(I,4H) bf16  w_h:(H,4H) bf16  bias:(1,4H) f32   (gate order [i|f|o|g])
    returns hs:(T,B,H) f32, cs:(T,B,H) f32
    """
    T, B, I = xs.shape
    H = h0.shape[-1]
    N4 = 4 * H

    TT = _pick_time_chunk(T, B, H)
    T_pad = -(-T // TT) * TT
    if T_pad != T:
        xs = jnp.pad(xs, ((0, T_pad - T), (0, 0), (0, 0)))

    # ---- Phase 1: big batched input projection (one pass, weights resident) ----
    M = T_pad * B
    x2d = xs.reshape(M, I).astype(jnp.bfloat16)        # cast once; halves HBM read
    TM = _pick_row_tile(M)

    proj_cost = pl.CostEstimate(
        flops=2 * M * I * N4,
        transcendentals=0,
        bytes_accessed=(x2d.size * x2d.dtype.itemsize
                        + w_x.size * w_x.dtype.itemsize
                        + bias.size * 4 + M * N4 * 4))

    gx = pl.pallas_call(
        _input_proj_kernel,
        out_shape=jax.ShapeDtypeStruct((M, N4), jnp.float32),
        grid_spec=pltpu.PrefetchScalarGridSpec(
            num_scalar_prefetch=0,
            grid=(M // TM,),
            in_specs=[
                pl.BlockSpec((TM, I), lambda m: (m, 0)),     # x rows
                pl.BlockSpec((I, N4), lambda m: (0, 0)),     # W_x: resident
                pl.BlockSpec((1, N4), lambda m: (0, 0)),     # bias: resident
            ],
            out_specs=pl.BlockSpec((TM, N4), lambda m: (m, 0)),
        ),
        compiler_params=pltpu.CompilerParams(
            dimension_semantics=("parallel",),
            vmem_limit_bytes=_VMEM_LIMIT),
        cost_estimate=proj_cost,
    )(x2d, w_x, bias)

    gx = gx.reshape(T_pad, B, N4)                       # row-major: free reshape

    # ---- Phase 2: recurrence (time-chunked grid, unrolled inner loop) ----
    rec_cost = pl.CostEstimate(
        flops=2 * T_pad * B * H * N4,
        transcendentals=T_pad * B * 5 * H,
        bytes_accessed=(T_pad * B * N4 * 4
                        + w_h.size * w_h.dtype.itemsize
                        + (h0.size + c0.size) * 4
                        + T_pad * B * 2 * H * 4))

    hc = pl.pallas_call(
        _recurrent_kernel,
        out_shape=jax.ShapeDtypeStruct((T_pad, B, 2 * H), jnp.float32),
        grid_spec=pltpu.PrefetchScalarGridSpec(
            num_scalar_prefetch=0,
            grid=(T_pad // TT,),
            in_specs=[
                pl.BlockSpec((TT, B, N4), lambda s: (s, 0, 0)),  # precomputed x-gates
                pl.BlockSpec((H, N4), lambda s: (0, 0)),         # W_h: resident
                pl.BlockSpec((B, H), lambda s: (0, 0)),          # h0
                pl.BlockSpec((B, H), lambda s: (0, 0)),          # c0
            ],
            out_specs=pl.BlockSpec((TT, B, 2 * H), lambda s: (s, 0, 0)),
            scratch_shapes=[
                pltpu.VMEM((B, H), jnp.bfloat16),   # h carry (matmul operand dtype)
                pltpu.VMEM((B, H), jnp.float32),    # c carry (exact)
            ],
        ),
        compiler_params=pltpu.CompilerParams(
            dimension_semantics=("arbitrary",),      # time is a recurrence
            vmem_limit_bytes=_VMEM_LIMIT),
        cost_estimate=rec_cost,
    )(gx, w_h, h0, c0)

    hs = hc[:T, :, :H]
    cs = hc[:T, :, H:]
    return hs, cs


lstm_sequence = jax.jit(_lstm_sequence_impl)


def _to_kernel_gate_order(w):
    """PyTorch gate order [i|f|g|o] (last dim) -> kernel order [i|f|o|g]."""
    i, f, g, o = jnp.split(w, 4, axis=-1)
    return jnp.concatenate([i, f, o, g], axis=-1)


class StackLSTM:
    """JAX/Pallas port of the PyTorch StackLSTM (forward == push)."""

    def __init__(self, input_size, hidden_size, std=0.02, seed=0):
        key = jax.random.PRNGKey(seed)
        k_h0, k_c0, k_wih, k_whh, k_bih, k_bhh = jax.random.split(key, 6)
        self.input_size = input_size
        self.hidden_size = hidden_size
        # nn.Parameter(zeros(H).unsqueeze(0)) then normal_(std=std) -> (1, H)
        self.h0 = std * jax.random.normal(k_h0, (1, hidden_size), jnp.float32)
        self.c0 = std * jax.random.normal(k_c0, (1, hidden_size), jnp.float32)
        # Synthetic nn.LSTMCell params, pre-transposed, PyTorch gate order [i|f|g|o].
        w_ih_t = std * jax.random.normal(k_wih, (input_size, 4 * hidden_size), jnp.float32)
        w_hh_t = std * jax.random.normal(k_whh, (hidden_size, 4 * hidden_size), jnp.float32)
        b_ih = std * jax.random.normal(k_bih, (4 * hidden_size,), jnp.float32)
        b_hh = std * jax.random.normal(k_bhh, (4 * hidden_size,), jnp.float32)
        # f32 PyTorch-order copies kept only for the pure-JAX reference check.
        self._w_ih_t = w_ih_t
        self._w_hh_t = w_hh_t
        self._bias_pt = (b_ih + b_hh).reshape(1, 4 * hidden_size)
        # Kernel-ready params: gate order [i|f|o|g], bf16 weights, biases pre-summed.
        self.w_x = _to_kernel_gate_order(w_ih_t).astype(jnp.bfloat16)   # (I, 4H)
        self.w_h = _to_kernel_gate_order(w_hh_t).astype(jnp.bfloat16)   # (H, 4H)
        self.bias = _to_kernel_gate_order(self._bias_pt)                # (1, 4H) f32
        self.stack_state_hist = [(self.h0, self.c0)]
        self.position_id_stack = [None]

    # -- forward / push -----------------------------------------------------
    def __call__(self, inputs, position_idx):
        return self.push(inputs, position_idx)

    def _top_state(self, batch):
        h_prev, c_prev = self.stack_state_hist[-1]
        h_prev = jnp.broadcast_to(h_prev, (batch, self.hidden_size)).astype(jnp.float32)
        c_prev = jnp.broadcast_to(c_prev, (batch, self.hidden_size)).astype(jnp.float32)
        return h_prev, c_prev

    def push(self, inputs, position_idx):
        """Single push (T=1 of the fused pipeline)."""
        B = inputs.shape[0]
        h_prev, c_prev = self._top_state(B)
        hs, cs = lstm_sequence(inputs[None], h_prev, c_prev,
                               self.w_x, self.w_h, self.bias)
        h_new, c_new = hs[0], cs[0]
        self.stack_state_hist.append((h_new, c_new))
        self.position_id_stack.append(position_idx)
        return h_new

    def push_sequence(self, inputs_seq, position_ids):
        """T consecutive pushes fused (one input-projection matmul + one
        time-chunked recurrent kernel). Semantically == T push() calls."""
        T, B = inputs_seq.shape[0], inputs_seq.shape[1]
        assert len(position_ids) == T
        h_prev, c_prev = self._top_state(B)
        hs, cs = lstm_sequence(inputs_seq, h_prev, c_prev,
                               self.w_x, self.w_h, self.bias)
        for t in range(T):
            self.stack_state_hist.append((hs[t], cs[t]))
            self.position_id_stack.append(position_ids[t])
        return hs

    # -- stack bookkeeping (host-side glue, as in the PyTorch module) --------
    def pop(self):
        if len(self.stack_state_hist) > 1:
            return (self.stack_state_hist.pop(), self.position_id_stack.pop())
        raise IndexError("pop from empty StackLSTM.")

    def peek(self):
        if len(self.stack_state_hist) > 1:
            return (self.stack_state_hist[-1], self.position_id_stack[-1])
        raise IndexError("peek from empty StackLSTM.")

    def top(self):
        return (self.stack_state_hist[-1], self.position_id_stack[-1])

    def reset_state(self):
        self.stack_state_hist = [(self.h0, self.c0)]
        self.position_id_stack = [None]

    def __bool__(self):
        return bool(len(self))

    def __len__(self):
        return len(self.stack_state_hist) - 1


# ---------------------------------------------------------------------------
# Plain-JAX reference: standard PyTorch gate order [i|f|g|o], same bf16
# quantization of x/h/weights, f32 gates/state.  Validates both the gate
# reordering and the split (input-proj + recurrent) matmuls in the kernels.
# ---------------------------------------------------------------------------
def _reference_sequence(xs, h0, c0, w_ih_t, w_hh_t, bias_pt):
    H = h0.shape[-1]
    wx = w_ih_t.astype(jnp.bfloat16)
    wh = w_hh_t.astype(jnp.bfloat16)

    def step(carry, x):
        h, c = carry
        gates = (jnp.dot(x.astype(jnp.bfloat16), wx, preferred_element_type=jnp.float32)
                 + jnp.dot(h.astype(jnp.bfloat16), wh, preferred_element_type=jnp.float32)
                 + bias_pt)
        i = jax.nn.sigmoid(gates[:, 0 * H:1 * H])
        f = jax.nn.sigmoid(gates[:, 1 * H:2 * H])
        g = jnp.tanh(gates[:, 2 * H:3 * H])
        o = jax.nn.sigmoid(gates[:, 3 * H:4 * H])
        c_new = f * c + i * g
        h_new = o * jnp.tanh(c_new)
        return (h_new, c_new), (h_new, c_new)

    _, (hs, cs) = jax.lax.scan(step, (h0, c0), xs)
    return hs, cs


if __name__ == "__main__":
    batch, input_size, hidden_size, seq_len = 8, 64, 32, 6

    stack = StackLSTM(input_size, hidden_size, std=0.02, seed=0)

    key = jax.random.PRNGKey(0)
    xs = jax.random.normal(key, (seq_len, batch, input_size), jnp.float32)

    # Two individual pushes (exercise the per-step path + stack semantics) ...
    h1 = stack.push(xs[0], position_idx=0)
    h2 = stack.push(xs[1], position_idx=1)
    # ... then the remaining steps fused into one pipeline (the fast path).
    hs_rest = stack.push_sequence(xs[2:], position_ids=list(range(2, seq_len)))
    hs_rest = jax.block_until_ready(hs_rest)

    # Reference: same LSTMCell math in plain JAX, PyTorch gate order.
    h0 = jnp.broadcast_to(stack.h0, (batch, hidden_size))
    c0 = jnp.broadcast_to(stack.c0, (batch, hidden_size))
    hs_ref, cs_ref = _reference_sequence(xs, h0, c0,
                                         stack._w_ih_t, stack._w_hh_t, stack._bias_pt)

    tol = dict(atol=2e-3, rtol=2e-3)
    assert jnp.allclose(h1, hs_ref[0], **tol), "step-1 mismatch"
    assert jnp.allclose(h2, hs_ref[1], **tol), "step-2 mismatch"
    assert jnp.allclose(hs_rest, hs_ref[2:], **tol), "fused-sequence mismatch"
    assert jnp.allclose(stack.stack_state_hist[-1][1], cs_ref[-1], **tol), "cell-state mismatch"

    # Stack bookkeeping checks.
    assert len(stack) == seq_len and bool(stack)
    (top_state, top_pos) = stack.top()
    assert top_pos == seq_len - 1
    (_popped_state, popped_pos) = stack.pop()
    assert popped_pos == seq_len - 1 and len(stack) == seq_len - 1

    print("KERNEL_OK")
</pallas_src>

<mosaic_0001>
module attributes {stable_mosaic.version = 11 : i64} {
  func.func @_input_proj_kernel(%arg0: i32, %arg1: memref<8x64xbf16, #tpu.memory_space<vmem>>, %arg2: memref<64x128xbf16, #tpu.memory_space<vmem>>, %arg3: memref<1x128xf32, #tpu.memory_space<vmem>>, %arg4: memref<8x128xf32, #tpu.memory_space<vmem>>) attributes {dimension_semantics = [#tpu.dimension_semantics<parallel>], iteration_bounds = array<i64: 1>, scalar_prefetch = 0 : i64, scratch_operands = 0 : i64, tpu.core_type = #tpu.core_type<tc>, window_params = [{transform_indices = @transform_0, window_bounds = array<i64: 8, 64>}, {pipeline_mode = #tpu.pipeline_mode<synchronous>, transform_indices = @transform_1, window_bounds = array<i64: 64, 128>}, {pipeline_mode = #tpu.pipeline_mode<synchronous>, transform_indices = @transform_2, window_bounds = array<i64: 1, 128>}, {transform_indices = @transform_3, window_bounds = array<i64: 8, 128>}]} {
    %c0 = arith.constant 0 : index
    %c0_0 = arith.constant 0 : index
    %0 = vector.load %arg1[%c0, %c0_0] : memref<8x64xbf16, #tpu.memory_space<vmem>>, vector<8x64xbf16>
    %c0_1 = arith.constant 0 : index
    %c0_2 = arith.constant 0 : index
    %1 = vector.load %arg2[%c0_1, %c0_2] : memref<64x128xbf16, #tpu.memory_space<vmem>>, vector<64x128xbf16>
    %cst = arith.constant dense<0.000000e+00> : vector<8x128xf32>
    %2 = tpu.matmul %0, %1, %cst {dimension_numbers = #tpu.dot_dimension_numbers<[1], [0], [0], [1], [0, 0, 1, 1], [], []>} : vector<8x64xbf16>, vector<64x128xbf16>, vector<8x128xf32> -> vector<8x128xf32>
    %c0_3 = arith.constant 0 : index
    %c0_4 = arith.constant 0 : index
    %3 = vector.load %arg3[%c0_3, %c0_4] : memref<1x128xf32, #tpu.memory_space<vmem>>, vector<1x128xf32>
    %4 = vector.broadcast %3 : vector<1x128xf32> to vector<8x128xf32>
    %5 = arith.addf %2, %4 : vector<8x128xf32>
    %c0_5 = arith.constant 0 : index
    %c0_6 = arith.constant 0 : index
    %6 = vector.load %arg4[%c0_5, %c0_6] : memref<8x128xf32, #tpu.memory_space<vmem>>, vector<8x128xf32>
    tpu.vector_store %arg4[%c0_5, %c0_6], %5 {strides = array<i32>} : memref<8x128xf32, #tpu.memory_space<vmem>>, vector<8x128xf32>,
    return
  }
  func.func @transform_0(%arg0: i32) -> (i32, i32) {
    %c0_i32 = arith.constant 0 : i32
    %c0_i32_0 = arith.constant 0 : i32
    return %arg0, %c0_i32 : i32, i32
  }
  func.func @transform_1(%arg0: i32) -> (i32, i32) {
    %c0_i32 = arith.constant 0 : i32
    %c0_i32_0 = arith.constant 0 : i32
    %c0_i32_1 = arith.constant 0 : i32
    return %c0_i32, %c0_i32_0 : i32, i32
  }
  func.func @transform_2(%arg0: i32) -> (i32, i32) {
    %c0_i32 = arith.constant 0 : i32
    %c0_i32_0 = arith.constant 0 : i32
    %c0_i32_1 = arith.constant 0 : i32
    return %c0_i32, %c0_i32_0 : i32, i32
  }
  func.func @transform_3(%arg0: i32) -> (i32, i32) {
    %c0_i32 = arith.constant 0 : i32
    %c0_i32_0 = arith.constant 0 : i32
    return %arg0, %c0_i32 : i32, i32
  }
}

module attributes {stable_mosaic.version = 11 : i64} {
  func.func @_recurrent_kernel(%arg0: i32, %arg1: memref<1x8x128xf32, #tpu.memory_space<vmem>>, %arg2: memref<32x128xbf16, #tpu.memory_space<vmem>>, %arg3: memref<8x32xf32, #tpu.memory_space<vmem>>, %arg4: memref<8x32xf32, #tpu.memory_space<vmem>>, %arg5: memref<1x8x64xf32, #tpu.memory_space<vmem>>, %arg6: memref<8x32xbf16, #tpu.memory_space<vmem>>, %arg7: memref<8x32xf32, #tpu.memory_space<vmem>>) attributes {dimension_semantics = [#tpu.dimension_semantics<arbitrary>], iteration_bounds = array<i64: 1>, scalar_prefetch = 0 : i64, scratch_operands = 2 : i64, tpu.core_type = #tpu.core_type<tc>, window_params = [{transform_indices = @transform_0, window_bounds = array<i64: 1, 8, 128>}, {pipeline_mode = #tpu.pipeline_mode<synchronous>, transform_indices = @transform_1, window_bounds = array<i64: 32, 128>}, {pipeline_mode = #tpu.pipeline_mode<synchronous>, transform_indices = @transform_2, window_bounds = array<i64: 8, 32>}, {pipeline_mode = #tpu.pipeline_mode<synchronous>, transform_indices = @transform_3, window_bounds = array<i64: 8, 32>}, {transform_indices = @transform_4, window_bounds = array<i64: 1, 8, 64>}]} {
    %c0_i32 = arith.constant 0 : i32
    %0 = arith.cmpi eq, %arg0, %c0_i32 : i32
    %1 = arith.extui %0 : i1 to i32
    %c0_i32_0 = arith.constant 0 : i32
    %2 = arith.cmpi ne, %1, %c0_i32_0 : i32
    scf.if %2 {
      %c0_16 = arith.constant 0 : index
      %c0_17 = arith.constant 0 : index
      %35 = vector.load %arg3[%c0_16, %c0_17] : memref<8x32xf32, #tpu.memory_space<vmem>>, vector<8x32xf32>
      %36 = arith.truncf %35 : vector<8x32xf32> to vector<8x32xbf16>
      %c0_18 = arith.constant 0 : index
      %c0_19 = arith.constant 0 : index
      %37 = vector.load %arg6[%c0_18, %c0_19] : memref<8x32xbf16, #tpu.memory_space<vmem>>, vector<8x32xbf16>
      tpu.vector_store %arg6[%c0_18, %c0_19], %36 {strides = array<i32>} : memref<8x32xbf16, #tpu.memory_space<vmem>>, vector<8x32xbf16>,
      %c0_20 = arith.constant 0 : index
      %c0_21 = arith.constant 0 : index
      %38 = vector.load %arg4[%c0_20, %c0_21] : memref<8x32xf32, #tpu.memory_space<vmem>>, vector<8x32xf32>
      %c0_22 = arith.constant 0 : index
      %c0_23 = arith.constant 0 : index
      %39 = vector.load %arg7[%c0_22, %c0_23] : memref<8x32xf32, #tpu.memory_space<vmem>>, vector<8x32xf32>
      tpu.vector_store %arg7[%c0_22, %c0_23], %38 {strides = array<i32>} : memref<8x32xf32, #tpu.memory_space<vmem>>, vector<8x32xf32>,
    } else {
    }
    %c0_i32_1 = arith.constant 0 : i32
    %3 = arith.index_cast %c0_i32_1 : i32 to index
    %c0 = arith.constant 0 : index
    %c0_2 = arith.constant 0 : index
    %4 = vector.load %arg1[%3, %c0, %c0_2] : memref<1x8x128xf32, #tpu.memory_space<vmem>>, vector<1x8x128xf32>
    %5 = vector.shape_cast %4 : vector<1x8x128xf32> to vector<8x128xf32>
    %c0_3 = arith.constant 0 : index
    %c0_4 = arith.constant 0 : index
    %6 = vector.load %arg6[%c0_3, %c0_4] : memref<8x32xbf16, #tpu.memory_space<vmem>>, vector<8x32xbf16>
    %c0_5 = arith.constant 0 : index
    %c0_6 = arith.constant 0 : index
    %7 = vector.load %arg2[%c0_5, %c0_6] : memref<32x128xbf16, #tpu.memory_space<vmem>>, vector<32x128xbf16>
    %cst = arith.constant dense<0.000000e+00> : vector<8x128xf32>
    %8 = tpu.matmul %6, %7, %cst {dimension_numbers = #tpu.dot_dimension_numbers<[1], [0], [0], [1], [0, 0, 1, 1], [], []>} : vector<8x32xbf16>, vector<32x128xbf16>, vector<8x128xf32> -> vector<8x128xf32>
    %9 = arith.addf %5, %8 : vector<8x128xf32>
    %10 = vector.extract_strided_slice %9 {offsets = [0, 0], sizes = [8, 96], strides = [1, 1]} : vector<8x128xf32> to vector<8x96xf32>
    %11 = arith.negf %10 : vector<8x96xf32>
    %12 = math.exp %11 : vector<8x96xf32>
    %cst_7 = arith.constant 1.000000e+00 : f32
    %13 = vector.broadcast %cst_7 : f32 to vector<8x96xf32>
    %14 = arith.addf %13, %12 : vector<8x96xf32>
    %15 = arith.divf %13, %14 : vector<8x96xf32>
    %16 = vector.extract_strided_slice %15 {offsets = [0, 0], sizes = [8, 32], strides = [1, 1]} : vector<8x96xf32> to vector<8x32xf32>
    %17 = vector.extract_strided_slice %15 {offsets = [0, 32], sizes = [8, 32], strides = [1, 1]} : vector<8x96xf32> to vector<8x32xf32>
    %18 = vector.extract_strided_slice %15 {offsets = [0, 64], sizes = [8, 32], strides = [1, 1]} : vector<8x96xf32> to vector<8x32xf32>
    %19 = vector.extract_strided_slice %9 {offsets = [0, 96], sizes = [8, 32], strides = [1, 1]} : vector<8x128xf32> to vector<8x32xf32>
    %20 = math.tanh %19 : vector<8x32xf32>
    %c0_8 = arith.constant 0 : index
    %c0_9 = arith.constant 0 : index
    %21 = vector.load %arg7[%c0_8, %c0_9] : memref<8x32xf32, #tpu.memory_space<vmem>>, vector<8x32xf32>
    %22 = arith.mulf %17, %21 : vector<8x32xf32>
    %23 = arith.mulf %16, %20 : vector<8x32xf32>
    %24 = arith.addf %22, %23 : vector<8x32xf32>
    %25 = math.tanh %24 : vector<8x32xf32>
    %26 = arith.mulf %18, %25 : vector<8x32xf32>
    %27 = arith.truncf %26 : vector<8x32xf32> to vector<8x32xbf16>
    %c0_10 = arith.constant 0 : index
    %c0_11 = arith.constant 0 : index
    %28 = vector.load %arg6[%c0_10, %c0_11] : memref<8x32xbf16, #tpu.memory_space<vmem>>, vector<8x32xbf16>
    tpu.vector_store %arg6[%c0_10, %c0_11], %27 {strides = array<i32>} : memref<8x32xbf16, #tpu.memory_space<vmem>>, vector<8x32xbf16>,
    %c0_12 = arith.constant 0 : index
    %c0_13 = arith.constant 0 : index
    %29 = vector.load %arg7[%c0_12, %c0_13] : memref<8x32xf32, #tpu.memory_space<vmem>>, vector<8x32xf32>
    tpu.vector_store %arg7[%c0_12, %c0_13], %24 {strides = array<i32>} : memref<8x32xf32, #tpu.memory_space<vmem>>, vector<8x32xf32>,
    %30 = tpu.concatenate %26, %24 in 1 : vector<8x32xf32>, vector<8x32xf32> -> vector<8x64xf32>
    %31 = arith.index_cast %c0_i32_1 : i32 to index
    %c0_14 = arith.constant 0 : index
    %c0_15 = arith.constant 0 : index
    %32 = vector.load %arg5[%31, %c0_14, %c0_15] : memref<1x8x64xf32, #tpu.memory_space<vmem>>, vector<1x8x64xf32>
    %33 = vector.shape_cast %32 : vector<1x8x64xf32> to vector<8x64xf32>
    %34 = vector.shape_cast %30 : vector<8x64xf32> to vector<1x8x64xf32>
    tpu.vector_store %arg5[%31, %c0_14, %c0_15], %34 {strides = array<i32>} : memref<1x8x64xf32, #tpu.memory_space<vmem>>, vector<1x8x64xf32>,
    %c1_i32 = arith.constant 1 : i32
    return
  }
  func.func @transform_0(%arg0: i32) -> (i32, i32, i32) {
    %c0_i32 = arith.constant 0 : i32
    %c0_i32_0 = arith.constant 0 : i32
    %c0_i32_1 = arith.constant 0 : i32
    return %arg0, %c0_i32, %c0_i32_0 : i32, i32, i32
  }
  func.func @transform_1(%arg0: i32) -> (i32, i32) {
    %c0_i32 = arith.constant 0 : i32
    %c0_i32_0 = arith.constant 0 : i32
    %c0_i32_1 = arith.constant 0 : i32
    return %c0_i32, %c0_i32_0 : i32, i32
  }
  func.func @transform_2(%arg0: i32) -> (i32, i32) {
    %c0_i32 = arith.constant 0 : i32
    %c0_i32_0 = arith.constant 0 : i32
    %c0_i32_1 = arith.constant 0 : i32
    return %c0_i32, %c0_i32_0 : i32, i32
  }
  func.func @transform_3(%arg0: i32) -> (i32, i32) {
    %c0_i32 = arith.constant 0 : i32
    %c0_i32_0 = arith.constant 0 : i32
    %c0_i32_1 = arith.constant 0 : i32
    return %c0_i32, %c0_i32_0 : i32, i32
  }
  func.func @transform_4(%arg0: i32) -> (i32, i32, i32) {
    %c0_i32 = arith.constant 0 : i32
    %c0_i32_0 = arith.constant 0 : i32
    %c0_i32_1 = arith.constant 0 : i32
    return %arg0, %c0_i32, %c0_i32_0 : i32, i32, i32
  }
}

</mosaic_0001>

<bundles_post_ra>
// kernel: _lstm_sequence_impl.2
= control target key start
LH: loop header
LB: loop body
LE: loop exit
PB: predicated region body
PF: predicated region fallthrough
CT: control target
= control target key end

     0   :  { %8 = vsyncpa [#allocation3], 0  ;;  %s142_s15 = smov [#allocation2]   ;;  %s143_s17 = smov 64   ;;  %s177_s0 = inlined_call_operand.vmem [shape: bf16[8,64], index: 0, kind: input, shape index: {}]   ;;  %s178_s1 = inlined_call_operand.hbm [shape: bf16[64,128], index: 1, kind: input, shape index: {}]   ;;  %s179_s2 = inlined_call_operand.vmem [shape: f32[1,128], index: 2, kind: input, shape index: {}]   ;;  %s180_s3 = inlined_call_operand.vmem [shape: f32[8,128], index: 3, kind: output, shape index: {}]  }
   0x1   :  { %s15_s14 = sshll.u32 %s178_s1, 4  ;;  %s17_s16 = sshll.u32 %s142_s15, 4  ;;  %s16_s14 = int_to_ptr.hbm [resolvable:$true] %s15_s14  ;;  %s18_s16 = int_to_ptr.vmem [resolvable:$true] %s17_s16 }
   0x2   :  { %s144_s18 = smov 4  }
   0x3   :  { %23 = dma.hbm_to_vmem [thread:$0]  %s16_s14, 512, %s18_s16, [#allocation3], %s143_s17, %s143_s17, %s144_s18  }
   0x4   :  { %140 = dma.done.wait [#allocation3], 512  }
   0x5   :  { %141 = vsyncadd [#allocation3], 4294966784  ;;  %v111_v0 = vld [vmem:[#allocation2 + $0x18] sm:$0xff]  ;;  %v110_v1 = vld [vmem:[#allocation2 + $0x10] sm:$0xff]  ;;  %vm68_vm0 = vcmask 523264  }
   0x6   :  { %76 = vmatpush.bf16.msra.mxu0 %v111_v0  ;;  %v109_v2 = vld [vmem:[#allocation2 + $0x8] sm:$0xff]  ;;  %v108_v3 = vld [vmem:[#allocation2] sm:$0xff] }
   0x7   :  { %v31_v4 = vld [vmem:[%s177_s0] sm:$0xf] }
   0x8   :  { %v115_v5 = vld [vmem:[%s179_s2] ss:$0 sm:$0xff] }
   0xa   :  { %77 = vmatpush.bf16.msra.mxu0 %v110_v1 }
   0xe   :  { %78 = vmatpush.bf16.msra.mxu0 %v109_v2 }
  0x12   :  { %79 = vmatpush.bf16.msra.mxu0 %v108_v3 }
  0x15   :  { %107 = vmatmul.msk.bf16.vlgmr.msra.gmra.mxu0 %vm68_vm0, %v31_v4 }
  0x92   :  { %v81_v6 = vpop.f32.mrf.mxu0 }
  0x93   :  { %v82_v7 = vadd.f32 %v115_v5, %v81_v6 }
  0x95   :  { %85 = vst [vmem:[%s180_s3] sm:$0xff] %v82_v7 }
  0x9a   :  { %v83_v8 = vpop.f32.mrf.mxu0 }
  0x9b   :  { %90 = vsyncpa [#allocation3], 1 }

// kernel: _lstm_sequence_impl.3
= control target key start
LH: loop header
LB: loop body
LE: loop exit
PB: predicated region body
PF: predicated region fallthrough
CT: control target
= control target key end

     0   :  { %vm24_vm0 = vcmask 257024   ;;  %vm27_vm1 = vcmask 261120   ;;  %vm124_vm6 = vcmask 523264   ;;  %s209_s1 = inlined_call_operand.vmem [shape: bf16[32,128], index: 1, kind: input, shape index: {}]   ;;  %s210_s2 = inlined_call_operand.vmem [shape: f32[8,32], index: 2, kind: input, shape index: {}]   ;;  %s211_s3 = inlined_call_operand.vmem [shape: f32[8,32], index: 3, kind: input, shape index: {}]   ;;  %s212_s0 = inlined_call_operand.vmem [shape: f32[1,8,128], index: 0, kind: input, shape index: {}]   ;;  %s213_s4 = inlined_call_operand.vmem [shape: f32[1,8,64], index: 4, kind: output, shape index: {}]  }
   0x1   :  { %v141_v0 = vld [vmem:[%s209_s1 + $0x8] sm:$0xff]  ;;  %v22_v1 = vld [vmem:[%s210_s2] sm:$0xff] }
   0x2   :  { %v23_v2 = vpack.c.bf16 %v22_v1, %v22_v1  ;;  %v26_v3 = vld [vmem:[%s211_s3] sm:$0xff]  ;;  %57 = vmatpush.bf16.msra.mxu0 %v141_v0  ;;  %s153_s3 = smov 32  }
   0x3   :  { %v140_v4 = vld [vmem:[%s209_s1] sm:$0xff]  ;;  %28 = vst.msk [vmem:[#allocation3] sm:$0xff] %vm27_vm1, %v26_v3  ;;  %s155_s1 = smov 64  }
   0x4   :  { %25 = vst.msk [vmem:[#allocation2] sm:$0xf] %vm24_vm0, %v23_v2  ;;  %v29_v6 = vld [vmem:[%s212_s0] sm:$0xff]  ;;  %s154_s0 = smov 96  }
   0x6   :  { %58 = vmatpush.bf16.msra.mxu0 %v140_v4 }
   0xa   :  { %v85_v11 = vld [vmem:[#allocation3] sm:$0xff] }
   0xb   :  { %v30_v5 = vld [vmem:[#allocation2] sm:$0xf] }
   0xc   :  { %138 = vmatmul.msk.bf16.vlgmr.msra.gmra.mxu0 %vm27_vm1, %v30_v5 }
  0x89   :  { %v60_v7 = vpop.f32.mrf.mxu0 }
  0x8a   :  { %v64_v8 = vadd.f32 %v60_v7, %v29_v6 }
  0x8c   :  { %145 = vtanh.f32 %v64_v8  ;;  %v139_v12 = vmul.f32 -1.442695, %v64_v8 }
  0x8e   :  { %147 = vpow2.f32 %v139_v12 }
  0x91   :  { %v62_v9 = vpop.f32.mrf.mxu0 }
  0x92   :  { %v146_v10 = vpop.eup %145 }
  0x93   :  { %92 = vrot.lane.b32.xlu0 %v146_v10, %s153_s3 }
  0x94   :  { %v148_v13 = vpop.eup %147 }
  0x95   :  { %v68_v14 = vadd.f32 1.0, %v148_v13 }
  0x97   :  { %149 = vrcp.f32 %v68_v14  ;;  %v80_v20 = vand.u32 2147483648, %v68_v14  ;;  %vm74_vm3 = vweird.f32 %v68_v14  ;;  %v78_v21 = vand.u32 2147483647, %v68_v14 }
  0x99   :  { %v81_v23 = vor.u32 1.1754944e-38, %v80_v20  ;;  %vm79_vm5 = vcmp.eq.f32.partialorder %v78_v21, 8.507059e+37 }
  0x9b   :  { %87 = vrot.lane.b32.xlu0 %v85_v11, %s153_s3 }
  0x9d   :  { %v150_v15 = vpop.eup %149 }
  0x9e   :  { %v70_v16 = vmul.f32 %v150_v15, %v68_v14  ;;  %vm75_vm2 = vweird.f32 %v150_v15 }
  0x9f   :  { %vm76_vm4 = vmor %vm74_vm3, %vm75_vm2 }
  0xa0   :  { %v71_v17 = vsub.f32 1.0, %v70_v16 }
  0xa2   :  { %v72_v18 = vmul.f32 %v150_v15, %v71_v17 }
  0xa4   :  { %v73_v19 = vadd.f32 %v150_v15, %v72_v18 }
  0xa6   :  { %v77_v22 = vsel %vm76_vm4, %v150_v15, %v73_v19 }
  0xa7   :  { %v82_v25 = vsel %vm79_vm5, %v81_v23, %v77_v22 }
 0x105   :  { %v93_v24 = vpop.permute.xlu0 %92 }
 0x106   :  { %v95_v26 = vmul.f32 %v93_v24, %v82_v25 }
 0x108   :  { %97 = vrot.lane.b32.xlu1 %v95_v26, %s153_s3 }
 0x10d   :  { %v88_v27 = vpop.permute.xlu0 %87 }
 0x10e   :  { %v90_v28 = vmul.f32 %v88_v27, %v82_v25 }
 0x17a   :  { %v98_v29 = vpop.permute.xlu1 %97 }
 0x17b   :  { %v100_v30 = vadd.f32 %v98_v29, %v90_v28 }
 0x17d   :  { %151 = vtanh.f32 %v100_v30  ;;  %115 = vrot.lane.b32.xlu0 %v100_v30, %s154_s0 }
 0x183   :  { %v152_v31 = vpop.eup %151 }
 0x184   :  { %103 = vrot.lane.b32.xlu1 %v152_v31, %s153_s3 }
 0x1ef   :  { %v116_v32 = vpop.permute.xlu0 %115 }
 0x1f0   :  { %118 = vst.msk [vmem:[#allocation3] sm:$0xff] %vm27_vm1, %v116_v32 }
 0x1f6   :  { %v104_v33 = vpop.permute.xlu1 %103 }
 0x1f7   :  { %v106_v34 = vmul.f32 %v104_v33, %v82_v25 }
 0x1f9   :  { %120 = vrot.lane.b32.xlu2 %v106_v34, %s155_s1  ;;  %v107_v35 = vpack.c.bf16 %v106_v34, %v106_v34 }
 0x201   :  { %109 = vrot.lane.b32.xlu2 %v107_v35, %s155_s1 }
 0x253   :  { %v121_v36 = vpop.permute.xlu2 %120 }
 0x254   :  { %v123_v37 = vsel %vm27_vm1, %v121_v36, %v100_v30 }
 0x255   :  { %125 = vst.msk [vmem:[%s213_s4] sm:$0xff] %vm124_vm6, %v123_v37 }
 0x25b   :  { %v110_v38 = vpop.permute.xlu2 %109 }
 0x25c   :  { %113 = vst.msk [vmem:[#allocation2] sm:$0xf] %vm24_vm0, %v110_v38 }

</bundles_post_ra>
